<compile_context>
chip_gen: v7x
topology: tpu7x:2x2x1
jax: 0.10.0
libtpu: 0.0.40
codegen_flags: <defaults>
</compile_context>

<pallas_src>
import math
import functools

import jax
import jax.numpy as jnp
from jax import lax
from jax.experimental import pallas as pl
from jax.experimental.pallas import tpu as pltpu


def _pick_tile(dim, preferred, align):
    """Largest tile <= preferred that divides `dim` and is a multiple of `align`.
    Falls back to the full dim (always a legal BlockSpec block)."""
    if dim <= preferred:
        return dim
    t = (preferred // align) * align
    while t >= align:
        if dim % t == 0:
            return t
        t -= align
    return dim


# ----------------------------------------------------------------------------
# Kernel 1: tiled/pipelined linear layer  y = x @ W + b
# ----------------------------------------------------------------------------
def _linear_kernel_f32out(x_ref, w_ref, b_ref, o_ref):
    """f32 output: accumulate directly into the resident output block."""
    @pl.when(pl.program_id(2) == 0)
    def _init():
        o_ref[...] = jnp.broadcast_to(b_ref[...], o_ref.shape).astype(o_ref.dtype)

    o_ref[...] += jnp.dot(x_ref[...], w_ref[...],
                          preferred_element_type=jnp.float32)


def _linear_kernel_acc(x_ref, w_ref, b_ref, o_ref, acc_ref):
    """Non-f32 output: f32 VMEM accumulator, cast once at the last K step."""
    @pl.when(pl.program_id(2) == 0)
    def _init():
        acc_ref[...] = jnp.broadcast_to(b_ref[...], acc_ref.shape)

    acc_ref[...] += jnp.dot(x_ref[...], w_ref[...],
                            preferred_element_type=jnp.float32)

    @pl.when(pl.program_id(2) == pl.num_programs(2) - 1)
    def _finalize():
        o_ref[...] = acc_ref[...].astype(o_ref.dtype)


def pallas_linear(x2d, w, b, *, out_dtype=jnp.float32, mxu_dtype=None,
                  tm=256, tn=256, tk=512):
    """x2d: (M, K), w: (K, N), b: (N,) -> (M, N) in out_dtype."""
    M, K = x2d.shape
    N = w.shape[1]

    in_dtype = mxu_dtype if mxu_dtype is not None else jnp.float32
    if x2d.dtype != jnp.dtype(in_dtype):
        x2d = x2d.astype(in_dtype)
    if w.dtype != jnp.dtype(in_dtype):
        w = w.astype(in_dtype)          # pre-cast weights to avoid this per call
    b2d = b.astype(jnp.float32).reshape(1, N)

    tm = _pick_tile(M, tm, 8)
    tn = _pick_tile(N, tn, 128)
    tk = _pick_tile(K, tk, 128)
    grid = (M // tm, N // tn, K // tk)

    bytes_accessed = (int(x2d.size) * x2d.dtype.itemsize
                      + int(w.size) * w.dtype.itemsize
                      + 4 * N + jnp.dtype(out_dtype).itemsize * M * N)
    cost = pl.CostEstimate(flops=2 * M * N * K, transcendentals=0,
                           bytes_accessed=int(bytes_accessed))

    use_acc_scratch = jnp.dtype(out_dtype) != jnp.dtype(jnp.float32)
    kernel = _linear_kernel_acc if use_acc_scratch else _linear_kernel_f32out
    scratch = [pltpu.VMEM((tm, tn), jnp.float32)] if use_acc_scratch else []

    return pl.pallas_call(
        kernel,
        out_shape=jax.ShapeDtypeStruct((M, N), out_dtype),
        grid=grid,
        in_specs=[
            pl.BlockSpec((tm, tk), lambda i, j, k: (i, k)),
            pl.BlockSpec((tk, tn), lambda i, j, k: (k, j)),
            pl.BlockSpec((1, tn), lambda i, j, k: (0, j)),
        ],
        out_specs=pl.BlockSpec((tm, tn), lambda i, j, k: (i, j)),
        scratch_shapes=scratch,
        compiler_params=pltpu.CompilerParams(
            dimension_semantics=("parallel", "parallel", "arbitrary"),
            vmem_limit_bytes=32 * 1024 * 1024),
        cost_estimate=cost,
    )(x2d, w, b2d)


# ----------------------------------------------------------------------------
# Kernel 2: flash-style scaled dot-product attention
#   grid = (batch, q_tiles, kv_tiles); all heads of one batch handled per step.
# ----------------------------------------------------------------------------
def _flash_attention_kernel(*refs, scale, has_mask, causal, compute_dtype):
    if has_mask:
        q_ref, k_ref, v_ref, mask_ref, o_ref, m_sc, l_sc, acc_sc = refs
    else:
        q_ref, k_ref, v_ref, o_ref, m_sc, l_sc, acc_sc = refs
        mask_ref = None

    qi = pl.program_id(1)
    ki = pl.program_id(2)
    tq = q_ref.shape[2]
    tk = k_ref.shape[2]

    @pl.when(ki == 0)
    def _init():
        m_sc[...] = jnp.full_like(m_sc, -jnp.inf)
        l_sc[...] = jnp.zeros_like(l_sc)
        acc_sc[...] = jnp.zeros_like(acc_sc)

    def _compute():
        # Fold 1/sqrt(hd) into q (H*tq*hd mults, not H*tq*tk); bf16 MXU inputs,
        # f32 accumulation / softmax.
        q = (q_ref[0].astype(jnp.float32) * scale).astype(compute_dtype)
        k = k_ref[0].astype(compute_dtype)
        v = v_ref[0].astype(compute_dtype)

        # QK^T via contraction on the last dims (no explicit transpose).
        s = jnp.einsum("hqd,hkd->hqk", q, k,
                       preferred_element_type=jnp.float32)   # (H, tq, tk) f32

        if has_mask:
            # mask block keeps its own (possibly size-1) dims; broadcasts here.
            s = s + mask_ref[0].astype(jnp.float32)
        if causal:
            # Structural mask built in-kernel: zero HBM traffic.
            q_pos = qi * tq + lax.broadcasted_iota(jnp.int32, (tq, tk), 0)
            k_pos = ki * tk + lax.broadcasted_iota(jnp.int32, (tq, tk), 1)
            s = jnp.where((k_pos <= q_pos)[None, :, :], s, -1e30)

        m_prev = m_sc[...]
        m_new = jnp.maximum(m_prev, jnp.max(s, axis=-1, keepdims=True))
        alpha = jnp.exp(m_prev - m_new)
        p = jnp.exp(s - m_new)
        l_sc[...] = alpha * l_sc[...] + jnp.sum(p, axis=-1, keepdims=True)
        acc_sc[...] = alpha * acc_sc[...] + jnp.einsum(
            "hqk,hkd->hqd", p.astype(compute_dtype), v,
            preferred_element_type=jnp.float32)
        m_sc[...] = m_new

    if causal:
        # Skip KV tiles that lie entirely above the diagonal (~2x fewer flops).
        @pl.when(ki * tk < (qi + 1) * tq)
        def _():
            _compute()
    else:
        _compute()

    @pl.when(ki == pl.num_programs(2) - 1)
    def _finalize():
        inv_l = pl.reciprocal(l_sc[...], approx=True)   # EUP slot, off the VALU
        o_ref[0] = (acc_sc[...] * inv_l).astype(o_ref.dtype)


def pallas_scaled_dot_product(q, k, v, mask=None, *, causal=False,
                              compute_dtype=jnp.bfloat16,
                              out_dtype=jnp.float32, tq=128, tk=128):
    """q, k, v: (B, H, S, hd). `mask` is additive, broadcastable to (B,H,S,S)
    (never materialized dense); `causal=True` builds the mask in-kernel."""
    B, H, S, hd = q.shape
    scale = 1.0 / math.sqrt(hd)
    has_mask = mask is not None

    # 128-aligned tiles keep the MXU pipes and vst lanes full (fallback: full S).
    tq = _pick_tile(S, tq, 128)
    tk = _pick_tile(S, tk, 128)
    grid = (B, S // tq, S // tk)

    in_specs = [
        pl.BlockSpec((1, H, tq, hd), lambda b, qi, ki: (b, 0, qi, 0)),
        pl.BlockSpec((1, H, tk, hd), lambda b, qi, ki: (b, 0, ki, 0)),
        pl.BlockSpec((1, H, tk, hd), lambda b, qi, ki: (b, 0, ki, 0)),
    ]
    args = [q, k, v]

    if has_mask:
        mask = jnp.asarray(mask).astype(jnp.float32)
        while mask.ndim < 4:
            mask = mask[None]
        Bm, Hm, Mq, Mk = (int(d) for d in mask.shape)
        assert Bm in (1, B) and Hm in (1, H) and Mq in (1, S) and Mk in (1, S), \
            "mask must be broadcastable to (B, H, S, S)"
        mq_blk = tq if Mq == S else 1
        mk_blk = tk if Mk == S else 1
        b_full, q_full, k_full = (Bm == B), (Mq == S), (Mk == S)

        def mask_map(b, qi, ki):
            return (b if b_full else 0, 0,
                    qi if q_full else 0, ki if k_full else 0)

        in_specs.append(pl.BlockSpec((1, Hm, mq_blk, mk_blk), mask_map))
        args.append(mask)

    flops = 4 * B * H * S * S * hd
    if causal:
        flops //= 2
    bytes_accessed = sum(int(a.size) * a.dtype.itemsize for a in args) \
        + jnp.dtype(out_dtype).itemsize * B * H * S * hd
    cost = pl.CostEstimate(flops=int(flops), transcendentals=B * H * S * S,
                           bytes_accessed=int(bytes_accessed))

    kernel = functools.partial(_flash_attention_kernel, scale=scale,
                               has_mask=has_mask, causal=causal,
                               compute_dtype=compute_dtype)
    return pl.pallas_call(
        kernel,
        out_shape=jax.ShapeDtypeStruct((B, H, S, hd), out_dtype),
        grid=grid,
        in_specs=in_specs,
        out_specs=pl.BlockSpec((1, H, tq, hd), lambda b, qi, ki: (b, 0, qi, 0)),
        scratch_shapes=[
            pltpu.VMEM((H, tq, 1), jnp.float32),   # running max
            pltpu.VMEM((H, tq, 1), jnp.float32),   # running sum
            pltpu.VMEM((H, tq, hd), jnp.float32),  # output accumulator
        ],
        compiler_params=pltpu.CompilerParams(
            dimension_semantics=("parallel", "parallel", "arbitrary"),
            vmem_limit_bytes=32 * 1024 * 1024),
        cost_estimate=cost,
    )(*args)


# ----------------------------------------------------------------------------
# Module equivalent
# ----------------------------------------------------------------------------
def init_mha_params(key, d_model, num_heads):
    """Mimics nn.Linear default init (uniform(-1/sqrt(in), 1/sqrt(in)))."""
    del num_heads
    k1, k2, k3, k4 = jax.random.split(key, 4)
    bound = 1.0 / math.sqrt(d_model)
    # weights stored as (in_features, out_features) so y = x @ W + b
    w_qkv = jax.random.uniform(k1, (d_model, 3 * d_model), jnp.float32, -bound, bound)
    b_qkv = jax.random.uniform(k2, (3 * d_model,), jnp.float32, -bound, bound)
    w_out = jax.random.uniform(k3, (d_model, d_model), jnp.float32, -bound, bound)
    b_out = jax.random.uniform(k4, (d_model,), jnp.float32, -bound, bound)
    return {"w_qkv": w_qkv, "b_qkv": b_qkv, "w_out": w_out, "b_out": b_out}


def cast_params_for_mxu(params, mxu_dtype):
    """Pre-cast weights once (avoid a per-forward K*N HBM cast pass)."""
    return {"w_qkv": params["w_qkv"].astype(mxu_dtype), "b_qkv": params["b_qkv"],
            "w_out": params["w_out"].astype(mxu_dtype), "b_out": params["b_out"]}


def multi_head_attention(x, params, num_heads, mask=None, *, causal=False,
                         mxu_dtype=None, attn_compute_dtype=jnp.bfloat16):
    """mxu_dtype=jnp.bfloat16: bf16 activations/weights through the linears and
    bf16 writeback of QKV / attention outputs (f32 accumulation everywhere).
    attn_compute_dtype: MXU input dtype for the attention GEMMs (default bf16;
    softmax math is always f32)."""
    B, S, D = x.shape
    hd = D // num_heads
    act_dtype = mxu_dtype if mxu_dtype is not None else jnp.float32

    # QKV projection (tiled Pallas matmul kernel), emitted directly in act_dtype.
    qkv = pallas_linear(x.reshape(B * S, D), params["w_qkv"], params["b_qkv"],
                        mxu_dtype=mxu_dtype, out_dtype=act_dtype)
    qkv = qkv.reshape(B, S, num_heads, 3 * hd).transpose(0, 2, 1, 3)  # (B,H,S,3hd)
    q, k, v = jnp.split(qkv, 3, axis=-1)

    # Flash-style scaled dot-product attention (Pallas kernel).
    values = pallas_scaled_dot_product(q, k, v, mask=mask, causal=causal,
                                       compute_dtype=attn_compute_dtype,
                                       out_dtype=act_dtype)   # (B, H, S, hd)

    # Exact PyTorch semantics: reshape WITHOUT permuting heads back (free view).
    values = values.reshape(B, S, num_heads * hd)

    # Output projection (tiled Pallas matmul kernel), module output in f32.
    out = pallas_linear(values.reshape(B * S, D), params["w_out"], params["b_out"],
                        mxu_dtype=mxu_dtype, out_dtype=jnp.float32)
    return out.reshape(B, S, D)


# ----------------------------------------------------------------------------
# Pure-JAX reference (mirrors the PyTorch code 1:1) for verification
# ----------------------------------------------------------------------------
def reference_mha(x, params, num_heads, mask=None):
    B, S, D = x.shape
    hd = D // num_heads
    qkv = x.reshape(B * S, D) @ params["w_qkv"] + params["b_qkv"]
    qkv = qkv.reshape(B, S, num_heads, 3 * hd).transpose(0, 2, 1, 3)
    q, k, v = jnp.split(qkv, 3, axis=-1)
    scaled = jnp.einsum("bhqd,bhkd->bhqk", q, k) / math.sqrt(hd)
    if mask is not None:
        scaled = scaled + mask
    attn = jax.nn.softmax(scaled, axis=-1)
    values = jnp.einsum("bhqk,bhkd->bhqd", attn, v)
    values = values.reshape(B, S, num_heads * hd)
    out = values.reshape(B * S, D) @ params["w_out"] + params["b_out"]
    return out.reshape(B, S, D)


if __name__ == "__main__":
    B, S, d_model, num_heads = 2, 8, 32, 4

    key = jax.random.PRNGKey(0)
    k_param, k_x, k_pad = jax.random.split(key, 3)
    params = init_mha_params(k_param, d_model, num_heads)
    x = jax.random.normal(k_x, (B, S, d_model), jnp.float32)

    ref = reference_mha(x, params, num_heads, mask=None)

    # 1) fully-f32 path (attention matmuls in f32 too); tolerance covers the
    #    approx reciprocal on the EUP.
    out = jax.block_until_ready(multi_head_attention(
        x, params, num_heads, attn_compute_dtype=jnp.float32))
    assert out.shape == (B, S, d_model)
    assert jnp.allclose(out, ref, atol=5e-3, rtol=5e-3), "f32 no-mask mismatch"

    # 2) default path: f32 activations, bf16 MXU inputs for the attention GEMMs.
    out_d = jax.block_until_ready(multi_head_attention(x, params, num_heads))
    assert jnp.allclose(out_d, ref, atol=3e-2, rtol=3e-2), "bf16-MXU attn mismatch"

    # 3) explicit additive (1,1,S,S) causal mask tensor (streamed, not broadcast).
    causal_add = jnp.where(jnp.tril(jnp.ones((S, S), dtype=bool)), 0.0, -1e9)
    mask = causal_add[None, None].astype(jnp.float32)
    ref_m = reference_mha(x, params, num_heads, mask=mask)
    out_m = jax.block_until_ready(multi_head_attention(
        x, params, num_heads, mask=mask, attn_compute_dtype=jnp.float32))
    assert jnp.allclose(out_m, ref_m, atol=5e-3, rtol=5e-3), "tensor-mask mismatch"

    # 4) in-kernel causal mask (zero HBM mask traffic + KV-tile skipping).
    out_c = jax.block_until_ready(multi_head_attention(
        x, params, num_heads, causal=True, attn_compute_dtype=jnp.float32))
    assert jnp.allclose(out_c, ref_m, atol=5e-3, rtol=5e-3), "causal mismatch"

    # 5) key-padding mask (B,1,1,S): exercises the size-1 block broadcast path.
    keep = jax.random.bernoulli(k_pad, 0.7, (B, 1, 1, S)).at[..., -1].set(True)
    pad_mask = jnp.where(keep, 0.0, -1e9).astype(jnp.float32)
    ref_p = reference_mha(x, params, num_heads, mask=pad_mask)
    out_p = jax.block_until_ready(multi_head_attention(
        x, params, num_heads, mask=pad_mask))
    assert jnp.allclose(out_p, ref_p, atol=3e-2, rtol=3e-2), "padding-mask mismatch"

    # 6) full bf16 activation/weight path with pre-cast weights.
    params_bf16 = cast_params_for_mxu(params, jnp.bfloat16)
    out_bf = jax.block_until_ready(multi_head_attention(
        x, params_bf16, num_heads, mxu_dtype=jnp.bfloat16))
    assert jnp.allclose(out_bf, ref, atol=6e-2, rtol=6e-2), "bf16 path mismatch"

    print("KERNEL_OK")
</pallas_src>

<mosaic_0001>
module attributes {stable_mosaic.version = 11 : i64} {
  func.func @_linear_kernel_f32out(%arg0: i32, %arg1: i32, %arg2: i32, %arg3: memref<16x32xf32, #tpu.memory_space<vmem>>, %arg4: memref<32x96xf32, #tpu.memory_space<vmem>>, %arg5: memref<1x96xf32, #tpu.memory_space<vmem>>, %arg6: memref<16x96xf32, #tpu.memory_space<vmem>>) attributes {dimension_semantics = [#tpu.dimension_semantics<parallel>, #tpu.dimension_semantics<parallel>, #tpu.dimension_semantics<arbitrary>], iteration_bounds = array<i64: 1, 1, 1>, scalar_prefetch = 0 : i64, scratch_operands = 0 : i64, tpu.core_type = #tpu.core_type<tc>, window_params = [{transform_indices = @transform_0, window_bounds = array<i64: 16, 32>}, {transform_indices = @transform_1, window_bounds = array<i64: 32, 96>}, {transform_indices = @transform_2, window_bounds = array<i64: 1, 96>}, {transform_indices = @transform_3, window_bounds = array<i64: 16, 96>}]} {
    %c0_i32 = arith.constant 0 : i32
    %0 = arith.cmpi eq, %arg2, %c0_i32 : i32
    %1 = arith.extui %0 : i1 to i32
    %c0_i32_0 = arith.constant 0 : i32
    %2 = arith.cmpi ne, %1, %c0_i32_0 : i32
    scf.if %2 {
      %c0_8 = arith.constant 0 : index
      %c0_9 = arith.constant 0 : index
      %9 = vector.load %arg5[%c0_8, %c0_9] : memref<1x96xf32, #tpu.memory_space<vmem>>, vector<1x96xf32>
      %10 = vector.shape_cast %9 : vector<1x96xf32> to vector<1x96xf32>
      %11 = vector.broadcast %10 : vector<1x96xf32> to vector<16x96xf32>
      %c0_10 = arith.constant 0 : index
      %c0_11 = arith.constant 0 : index
      %12 = vector.load %arg6[%c0_10, %c0_11] : memref<16x96xf32, #tpu.memory_space<vmem>>, vector<16x96xf32>
      tpu.vector_store %arg6[%c0_10, %c0_11], %11 {strides = array<i32>} : memref<16x96xf32, #tpu.memory_space<vmem>>, vector<16x96xf32>,
    } else {
    }
    %c0 = arith.constant 0 : index
    %c0_1 = arith.constant 0 : index
    %3 = vector.load %arg6[%c0, %c0_1] : memref<16x96xf32, #tpu.memory_space<vmem>>, vector<16x96xf32>
    %c0_2 = arith.constant 0 : index
    %c0_3 = arith.constant 0 : index
    %4 = vector.load %arg3[%c0_2, %c0_3] : memref<16x32xf32, #tpu.memory_space<vmem>>, vector<16x32xf32>
    %c0_4 = arith.constant 0 : index
    %c0_5 = arith.constant 0 : index
    %5 = vector.load %arg4[%c0_4, %c0_5] : memref<32x96xf32, #tpu.memory_space<vmem>>, vector<32x96xf32>
    %cst = arith.constant dense<0.000000e+00> : vector<16x96xf32>
    %6 = tpu.matmul %4, %5, %cst {dimension_numbers = #tpu.dot_dimension_numbers<[1], [0], [0], [1], [0, 0, 1, 1], [], []>} : vector<16x32xf32>, vector<32x96xf32>, vector<16x96xf32> -> vector<16x96xf32>
    %7 = arith.addf %3, %6 : vector<16x96xf32>
    %c0_6 = arith.constant 0 : index
    %c0_7 = arith.constant 0 : index
    %8 = vector.load %arg6[%c0_6, %c0_7] : memref<16x96xf32, #tpu.memory_space<vmem>>, vector<16x96xf32>
    tpu.vector_store %arg6[%c0_6, %c0_7], %7 {strides = array<i32>} : memref<16x96xf32, #tpu.memory_space<vmem>>, vector<16x96xf32>,
    return
  }
  func.func @transform_0(%arg0: i32, %arg1: i32, %arg2: i32) -> (i32, i32) {
    %c0_i32 = arith.constant 0 : i32
    return %arg0, %arg2 : i32, i32
  }
  func.func @transform_1(%arg0: i32, %arg1: i32, %arg2: i32) -> (i32, i32) {
    %c0_i32 = arith.constant 0 : i32
    return %arg2, %arg1 : i32, i32
  }
  func.func @transform_2(%arg0: i32, %arg1: i32, %arg2: i32) -> (i32, i32) {
    %c0_i32 = arith.constant 0 : i32
    %c0_i32_0 = arith.constant 0 : i32
    return %c0_i32, %arg1 : i32, i32
  }
  func.func @transform_3(%arg0: i32, %arg1: i32, %arg2: i32) -> (i32, i32) {
    %c0_i32 = arith.constant 0 : i32
    return %arg0, %arg1 : i32, i32
  }
}

</mosaic_0001>

<bundles_post_ra>
// kernel: tpu_custom_call.1
= control target key start
LH: loop header
LB: loop body
LE: loop exit
PB: predicated region body
PF: predicated region fallthrough
CT: control target
= control target key end

     0   :  { %8 = vsyncpa [#allocation3], 0  ;;  %s354_s0 = inlined_call_operand.hbm [shape: f32[16,32], index: 0, kind: input, shape index: {}]   ;;  %s355_s1 = inlined_call_operand.hbm [shape: f32[32,96], index: 1, kind: input, shape index: {}]   ;;  %s356_s2 = inlined_call_operand.vmem [shape: f32[1,96], index: 2, kind: input, shape index: {}]   ;;  %s357_s3 = inlined_call_operand.hbm [shape: f32[16,96], index: 3, kind: output, shape index: {}]  }
   0x1   :  { %9 = vsyncpa [#allocation6], 0 }
   0x2   :  { %10 = vsyncpa [#allocation4], 0  ;;  %s275_s12 = smov [#allocation2]   ;;  %s203_s16 = scalar_lea.hbm %s354_s0, 256 }
   0x3   :  { %s16_s13 = sshll.u32 %s275_s12, 4  ;;  %p204_p0 = scmp.ne.s32.totalorder %s354_s0, %s203_s16  ;;  %s17_s13 = int_to_ptr.vmem [resolvable:$true] %s16_s13 }
   0x4   :  { %p207_p1 = scmp.lt.u32.totalorder %s203_s16, %s354_s0 }
   0x6   :  { %p209_p2 = pnand %p207_p1, %p204_p0 }
   0x8   :  { %212 = shalt.err (!%p209_p2)
}
   0x9   :  { %s213_s21 = scalar_lea.vmem %s17_s13, 256  ;;  %p218_p4 = scmp.lt.s32.totalorder %s17_s13, %s17_s13 }
   0xa   :  { %p214_p3 = scmp.ne.s32.totalorder %s17_s13, %s213_s21  ;;  %p219_p5 = scmp.lt.s32.totalorder %s213_s21, %s213_s21 }
   0xc   :  { %p220_p6 = por %p219_p5, %p218_p4 }
   0xe   :  { %p221_p7 = pnand %p220_p6, %p214_p3 }
  0x10   :  { %224 = shalt.err (!%p221_p7)
}
  0x11   :  { %s276_s22 = smov 128   ;;  %s277_s23 = smov 8  }
  0x12   :  { %22 = dma.hbm_to_vmem [thread:$0]  %s354_s0, 256, %s17_s13, [#allocation3], %s276_s22, %s276_s22, %s277_s23  }
  0x13   :  { %s278_s26 = smov [#allocation5]   ;;  %s225_s30 = scalar_lea.hbm %s355_s1, 512 }
  0x14   :  { %s28_s27 = sshll.u32 %s278_s26, 4  ;;  %p226_p8 = scmp.ne.s32.totalorder %s355_s1, %s225_s30  ;;  %s29_s27 = int_to_ptr.vmem [resolvable:$true] %s28_s27 }
  0x15   :  { %p229_p9 = scmp.lt.u32.totalorder %s225_s30, %s355_s1 }
  0x17   :  { %p231_p10 = pnand %p229_p9, %p226_p8 }
  0x19   :  { %234 = shalt.err (!%p231_p10)
}
  0x1a   :  { %s235_s8 = scalar_lea.vmem %s29_s27, 512  ;;  %p240_p12 = scmp.lt.s32.totalorder %s29_s27, %s29_s27 }
  0x1b   :  { %p236_p11 = scmp.ne.s32.totalorder %s29_s27, %s235_s8  ;;  %p241_p13 = scmp.lt.s32.totalorder %s235_s8, %s235_s8 }
  0x1d   :  { %p242_p0 = por %p241_p13, %p240_p12 }
  0x1f   :  { %p243_p1 = pnand %p242_p0, %p236_p11 }
  0x21   :  { %246 = shalt.err (!%p243_p1)
}
  0x22   :  { %34 = dma.hbm_to_vmem [thread:$0]  %s355_s1, 512, %s29_s27, [#allocation6], %s276_s22, %s276_s22, %s277_s23  }
  0x23   :  { %269 = dma.done.wait [#allocation3], 256  }
  0x24   :  { %270 = vsyncadd [#allocation3], 4294967040 }
  0x25   :  { %271 = dma.done.wait [#allocation6], 512  }
  0x26   :  { %272 = vsyncadd [#allocation6], 4294966784  ;;  %vm65_vm0 = vcmask 261120   ;;  %v61_v0 = vld [vmem:[#allocation5] sm:$0xff]  ;;  %v62_v1 = vld [vmem:[#allocation5 + $0x8] sm:$0xff]  ;;  %vm54_vm1 = vcmask 785408  }
  0x27   :  { %v63_v2 = vld [vmem:[#allocation5 + $0x10] sm:$0xff]  ;;  %v190_v3 = vpack.c.bf16 %v62_v1, %v61_v0  ;;  %v64_v4 = vld [vmem:[#allocation5 + $0x18] sm:$0xff]  ;;  %s279_s1 = smov [#allocation7]  }
  0x28   :  { %v59_v5 = vld [vmem:[#allocation2] sm:$0xff]  ;;  %v194_v6 = vpack.c.bf16 %v64_v4, %v63_v2  ;;  %v60_v8 = vld [vmem:[#allocation2 + $0x8] sm:$0xff]  ;;  %s157_s12 = sshll.u32 %s279_s1, 4  ;;  %s158_s12 = int_to_ptr.vmem [resolvable:$true] %s157_s12 }
  0x29   :  { %187 = vmatprep.mubr.msk.f32.mxu0 %vm65_vm0, %v59_v5  ;;  %v170_v7 = vld [vmem:[%s356_s2] ss:$0 sm:$0xff]  ;;  %191 = vmatprep.subr.bf16.mxu0 %v190_v3  ;;  %s247_s2 = scalar_lea.vmem %s158_s12, 256  ;;  %p252_p3 = scmp.lt.s32.totalorder %s158_s12, %s158_s12 }
  0x2a   :  { %56 = vst.msk [vmem:[#allocation7 + $0x8] sm:$0xff] %vm54_vm1, %v170_v7  ;;  %55 = vst.msk [vmem:[#allocation7] sm:$0xff] %vm54_vm1, %v170_v7  ;;  %193 = vmatpush3.bf16.msra.mxu0 %v190_v3  ;;  %p248_p2 = scmp.ne.s32.totalorder %s158_s12, %s247_s2  ;;  %p253_p4 = scmp.lt.s32.totalorder %s247_s2, %s247_s2 }
  0x2b   :  { %195 = vmatprep.subr.bf16.mxu0 %v194_v6 }
  0x2c   :  { %p254_p5 = por %p253_p4, %p252_p3 }
  0x2e   :  { %197 = vmatpush3.bf16.msra.mxu0 %v194_v6  ;;  %p255_p6 = pnand %p254_p5, %p248_p2 }
  0x31   :  { %188 = vmatmul.mubr.msk.f32.vlgmr.msra.gmra.mrb[0].mxu0 %vm65_vm0, %v60_v8  ;;  %v58_v9 = vld [vmem:[#allocation7 + $0x8] sm:$0xff]  ;;  %v57_v10 = vld [vmem:[#allocation7] sm:$0xff] }
 0x104   :  { %v189_v11 = vpop.f32.mrb[0].mxu0 }
 0x105   :  { %v148_v12 = vadd.f32 %v189_v11, %v58_v9  ;;  %v138_v13 = vpop.f32.mrb[1].mxu0 }
 0x106   :  { %v147_v14 = vadd.f32 %v138_v13, %v57_v10 }
 0x107   :  { %151 = vst.msk [vmem:[#allocation7 + $0x8] sm:$0xff] %vm54_vm1, %v148_v12 }
 0x108   :  { %150 = vst.msk [vmem:[#allocation7] sm:$0xff] %vm54_vm1, %v147_v14 }
 0x109   :  { %258 = shalt.err (!%p255_p6)
}
 0x10a   :  { %s259_s15 = scalar_lea.hbm %s357_s3, 256 }
 0x10b   :  { %p260_p7 = scmp.ne.s32.totalorder %s357_s3, %s259_s15  ;;  %p263_p8 = scmp.lt.u32.totalorder %s259_s15, %s357_s3 }
 0x10d   :  { %p265_p9 = pnand %p263_p8, %p260_p7 }
 0x10f   :  { %268 = shalt.err (!%p265_p9)
}
 0x110   :  { %163 = dma.vmem_to_hbm [thread:$0]  %s158_s12, 256, %s357_s3, [#allocation4], %s276_s22, %s276_s22, %s277_s23  }
 0x111   :  { %273 = dma.done.wait [#allocation4], 256  }
 0x112   :  { %274 = vsyncadd [#allocation4], 4294967040 }
 0x113   :  { %167 = vsyncpa [#allocation3], 1 }
 0x114   :  { %168 = vsyncpa [#allocation6], 1 }
 0x115   :  { %169 = vsyncpa [#allocation4], 1 }

</bundles_post_ra>
